<compile_context>
chip_gen: v5e
topology: v5e:2x2
jax: 0.10.0
libtpu: 0.0.40
codegen_flags: <defaults>
</compile_context>

<pallas_src>
import functools
import math

import jax
import jax.numpy as jnp
from jax.experimental import pallas as pl
from jax.experimental.pallas import tpu as pltpu


CFG = dict(
    vocab_size=100,
    max_position=16,
    type_vocab=2,
    hidden=32,
    heads=4,
    layers=2,
    intermediate=128,
)


# ----------------------------- fused encoder kernel ------------------------ #

def _bert_encoder_kernel(
    x_ref,                       # (B, S, H)        embeddings, f32 (resident)
    eg_ref, eb_ref,              # (1, H)           embedding LayerNorm gamma/beta
    wqkv_ref, bqkv_ref,          # (1, nH, H, 3dH) bf16 / (1, nH, 1, 3dH) f32
    wo_ref, bo_ref,              # (1, nH, dH, H)  bf16 / (1, 1, H) f32
    l1g_ref, l1b_ref,            # (1, 1, H) f32
    w1_ref, b1_ref,              # (1, H, I) bf16  / (1, 1, I) f32
    w2_ref, b2_ref,              # (1, I, H) bf16  / (1, 1, H) f32
    l2g_ref, l2b_ref,            # (1, 1, H) f32
    o_ref,                       # (1, S, H)        last_hidden_state tile (batch b)
    h_scr,                       # (B, S, H) f32    VMEM-resident hidden states
    *, num_heads, head_dim):
    layer = pl.program_id(0)
    batch = pl.program_id(1)
    n_layers = pl.num_programs(0)
    H = num_heads * head_dim
    S = x_ref.shape[1]

    def layernorm(x, g, b):      # f32 statistics, BERT eps = 1e-12
        mu = jnp.mean(x, axis=-1, keepdims=True)
        var = jnp.mean(jnp.square(x - mu), axis=-1, keepdims=True)
        return (x - mu) * jax.lax.rsqrt(var + 1e-12) * g + b

    def gelu(x):                 # exact erf GELU (HF BERT "gelu")
        return 0.5 * x * (1.0 + jax.lax.erf(x * 0.7071067811865475))

    # Layer 0: seed this batch's resident hidden state with the embedding LN.
    @pl.when(layer == 0)
    def _():
        h_scr[batch] = layernorm(x_ref[batch].astype(jnp.float32),
                                 eg_ref[...], eb_ref[...])

    h = h_scr[batch]                                           # (S, H) f32
    h_bf = h.astype(jnp.bfloat16)

    # ---- self-attention: batched (over heads) MXU contractions -------------
    # Fused per-head QKV projection; 1/sqrt(dH) is pre-folded into Q weights.
    qkv = jnp.einsum("hsk,hkd->hsd",
                     jnp.broadcast_to(h_bf, (num_heads, S, H)), wqkv_ref[0],
                     preferred_element_type=jnp.float32) + bqkv_ref[0]  # (nH,S,3dH)
    q = qkv[:, :, :head_dim].astype(jnp.bfloat16)
    k = qkv[:, :, head_dim:2 * head_dim].astype(jnp.bfloat16)
    v = qkv[:, :, 2 * head_dim:].astype(jnp.bfloat16)

    s = jnp.einsum("hqd,hkd->hqk", q, k,
                   preferred_element_type=jnp.float32)                  # (nH,S,S)
    m = jnp.max(s, axis=-1, keepdims=True)
    p = jnp.exp(s - m)
    p = p * pl.reciprocal(jnp.sum(p, axis=-1, keepdims=True), approx=True)

    ctx = jnp.einsum("hqk,hkd->hqd", p.astype(jnp.bfloat16), v,
                     preferred_element_type=jnp.float32)                # (nH,S,dH)
    # Per-head row-slices of Wo:  sum_h ctx_h @ Wo[h]  ==  concat_h(ctx_h) @ Wo
    attn = jnp.einsum("hsd,hdk->hsk", ctx.astype(jnp.bfloat16), wo_ref[0],
                      preferred_element_type=jnp.float32)               # (nH,S,H)
    attn = jnp.sum(attn, axis=0) + bo_ref[0]                            # (S,H)

    # ---- add & LayerNorm 1 (residual fused into the LN) ----
    h = layernorm(h + attn, l1g_ref[0], l1b_ref[0])

    # ---- feed-forward: GELU fused onto w1, residual fused into LN2 ----
    inter = gelu(jnp.dot(h.astype(jnp.bfloat16), w1_ref[0],
                         preferred_element_type=jnp.float32) + b1_ref[0])  # (S,I)
    ffn = jnp.dot(inter.astype(jnp.bfloat16), w2_ref[0],
                  preferred_element_type=jnp.float32) + b2_ref[0]          # (S,H)
    h = layernorm(h + ffn, l2g_ref[0], l2b_ref[0])

    # Carry the hidden state for the next layer; ONLY the last layer stores
    # the output tile (saves the per-layer cast + vst on every other layer).
    @pl.when(layer < n_layers - 1)
    def _():
        h_scr[batch] = h

    @pl.when(layer == n_layers - 1)
    def _():
        o_ref[0] = h.astype(o_ref.dtype)


# ----------------------------- model definition ---------------------------- #

def init_params(key, cfg):
    """Synthetic, deterministic BERT weights, pre-laid-out for the kernel.

    Mapping to the standard nn.Linear parameterization:
      wqkv[l, h] = [Wq[:, h*dH:(h+1)*dH] / sqrt(dH) | Wk[:, h*dH:..] | Wv[:, h*dH:..]]
      wo[l, h]   = Wo[h*dH:(h+1)*dH, :]
    so that sum_h ctx_h @ wo[l, h] == concat_h(ctx_h) @ Wo, and the attention
    score scale 1/sqrt(dH) is folded into the Q projection (zero runtime cost).
    """
    std = 0.02
    H, I, L = cfg["hidden"], cfg["intermediate"], cfg["layers"]
    nH = cfg["heads"]
    dH = H // nH
    scale = 1.0 / math.sqrt(dH)

    def normal(k, shape):
        return (std * jax.random.normal(k, shape)).astype(jnp.float32)

    def per_head_cols(w):        # (L, H, H) -> (L, nH, H, dH), columns per head
        return jnp.transpose(w.reshape(L, H, nH, dH), (0, 2, 1, 3))

    (k_we, k_pe, k_te, k_q, k_k, k_v, k_o, k_1, k_2) = jax.random.split(key, 9)

    wq = normal(k_q, (L, H, H)) * scale    # attention scale folded into Q
    wk = normal(k_k, (L, H, H))
    wv = normal(k_v, (L, H, H))
    wqkv = jnp.concatenate(
        [per_head_cols(wq), per_head_cols(wk), per_head_cols(wv)], axis=-1)
    wo = normal(k_o, (L, H, H)).reshape(L, nH, dH, H)   # rows grouped per head

    return {
        "word_emb": normal(k_we, (cfg["vocab_size"], H)),
        "pos_emb": normal(k_pe, (cfg["max_position"], H)),
        "type_emb": normal(k_te, (cfg["type_vocab"], H)),
        "emb_ln_g": jnp.ones((1, H), jnp.float32),
        "emb_ln_b": jnp.zeros((1, H), jnp.float32),
        "wqkv": wqkv.astype(jnp.bfloat16),                  # (L, nH, H, 3dH)
        "bqkv": jnp.zeros((L, nH, 1, 3 * dH), jnp.float32),
        "wo": wo.astype(jnp.bfloat16),                      # (L, nH, dH, H) bf16 now
        "bo": jnp.zeros((L, 1, H), jnp.float32),
        "ln1_g": jnp.ones((L, 1, H), jnp.float32),
        "ln1_b": jnp.zeros((L, 1, H), jnp.float32),
        "w1": normal(k_1, (L, H, I)).astype(jnp.bfloat16),
        "b1": jnp.zeros((L, 1, I), jnp.float32),
        "w2": normal(k_2, (L, I, H)).astype(jnp.bfloat16),
        "b2": jnp.zeros((L, 1, H), jnp.float32),
        "ln2_g": jnp.ones((L, 1, H), jnp.float32),
        "ln2_b": jnp.zeros((L, 1, H), jnp.float32),
    }


def bert_encoder_forward(params, input_ids, cfg):
    """Equivalent of BertEncoder.forward: returns last_hidden_state (B, S, H).
    Dropout is identity (inference), attention_mask=None (no masking);
    `mention_or_context` does not affect the computation."""
    B, S = input_ids.shape
    H, nH, L, I = cfg["hidden"], cfg["heads"], cfg["layers"], cfg["intermediate"]
    dH = H // nH

    # --- embedding gathers are glue; everything else runs in one kernel ---
    word = jnp.take(params["word_emb"], input_ids, axis=0)            # (B, S, H)
    pos = params["pos_emb"][:S][None, :, :]                           # (1, S, H)
    ttype = params["type_emb"][0][None, None, :]                      # token_type_ids = 0
    emb = (word + pos + ttype).astype(jnp.float32)                    # (B, S, H)

    def per_layer(shape):   # layer-stacked param: layer l's slice, reused for all b
        return pl.BlockSpec((1,) + tuple(shape[1:]),
                            lambda l, b: (l,) + (0,) * (len(shape) - 1))

    def shared(shape):      # layer-invariant tiny param: resident whole kernel
        return pl.BlockSpec(tuple(shape), lambda l, b: (0,) * len(shape))

    in_specs = [
        # TODO(synk): at BERT-base scale put embeddings in pl.ANY and DMA them
        # only under layer==0 instead of keeping the full slab resident.
        pl.BlockSpec((B, S, H), lambda l, b: (0, 0, 0)),   # embeddings (fetched once)
        shared((1, H)), shared((1, H)),                    # emb LN gamma / beta
        per_layer((L, nH, H, 3 * dH)), per_layer((L, nH, 1, 3 * dH)),  # wqkv, bqkv
        per_layer((L, nH, dH, H)), per_layer((L, 1, H)),               # wo, bo
        per_layer((L, 1, H)), per_layer((L, 1, H)),                    # ln1 g/b
        per_layer((L, H, I)), per_layer((L, 1, I)),                    # w1, b1
        per_layer((L, I, H)), per_layer((L, 1, H)),                    # w2, b2
        per_layer((L, 1, H)), per_layer((L, 1, H)),                    # ln2 g/b
    ]
    out_spec = pl.BlockSpec((1, S, H), lambda l, b: (b, 0, 0))

    flops = L * B * (2 * S * H * 3 * H          # fused QKV projection
                     + 4 * nH * S * S * dH      # scores + context
                     + 2 * S * H * H            # output projection
                     + 4 * S * H * I)           # FFN
    transcendentals = L * B * (nH * S * S + S * I)
    weight_bytes = L * (2 * (H * 3 * H + H * H + H * I + I * H)   # bf16 weights, once/layer
                        + 4 * (3 * H + H + I + H + 4 * H))        # f32 biases + LN params
    act_bytes = 4 * B * S * H * (1 + L)   # embeddings in + per-visit output writebacks
    cost = pl.CostEstimate(flops=int(flops),
                           transcendentals=int(transcendentals),
                           bytes_accessed=int(weight_bytes + act_bytes + 4 * 2 * H))

    kernel = functools.partial(_bert_encoder_kernel, num_heads=nH, head_dim=dH)

    out = pl.pallas_call(
        kernel,
        out_shape=jax.ShapeDtypeStruct((B, S, H), jnp.float32),
        grid_spec=pltpu.PrefetchScalarGridSpec(
            num_scalar_prefetch=0,
            # Layer OUTER: each layer's weights are DMA'd once and reused for
            # every batch tile; batch INNER: per-batch hidden states carried
            # in the (B, S, H) VMEM scratch across the sequential layer axis.
            grid=(L, B),
            in_specs=in_specs,
            out_specs=out_spec,
            scratch_shapes=[pltpu.VMEM((B, S, H), jnp.float32)],
        ),
        # TODO(synk): at BERT-base scale tile M=B*S on the inner axis and mark
        # it "parallel" (shares one weight fetch across v7x's 2 TensorCores),
        # with 256-aligned K/N weight tiles and explicit vmem_limit_bytes.
        compiler_params=pltpu.CompilerParams(
            dimension_semantics=("arbitrary", "arbitrary")),
        cost_estimate=cost,
    )(emb,
      params["emb_ln_g"], params["emb_ln_b"],
      params["wqkv"], params["bqkv"],
      params["wo"], params["bo"],
      params["ln1_g"], params["ln1_b"],
      params["w1"], params["b1"],
      params["w2"], params["b2"],
      params["ln2_g"], params["ln2_b"])

    return out


# ---------------------------------- main ----------------------------------- #

if __name__ == "__main__":
    key = jax.random.PRNGKey(0)
    k_params, k_ids = jax.random.split(key)

    params = init_params(k_params, CFG)

    B, S = 2, 8
    input_ids = jax.random.randint(k_ids, (B, S), 0, CFG["vocab_size"],
                                   dtype=jnp.int32)

    # "mention_or_context" in the original forward does not affect the math.
    fwd = jax.jit(functools.partial(bert_encoder_forward, cfg=CFG))
    last_hidden_state = jax.block_until_ready(fwd(params, input_ids))

    assert last_hidden_state.shape == (B, S, CFG["hidden"])
    assert bool(jnp.all(jnp.isfinite(last_hidden_state)))
    print("KERNEL_OK")
</pallas_src>

<mosaic_0001>
module attributes {stable_mosaic.version = 11 : i64} {
  func.func @_bert_encoder_kernel(%arg0: i32, %arg1: i32, %arg2: memref<2x8x32xf32, #tpu.memory_space<vmem>>, %arg3: memref<1x32xf32, #tpu.memory_space<vmem>>, %arg4: memref<1x32xf32, #tpu.memory_space<vmem>>, %arg5: memref<1x4x32x24xbf16, #tpu.memory_space<vmem>>, %arg6: memref<1x4x1x24xf32, #tpu.memory_space<vmem>>, %arg7: memref<1x4x8x32xbf16, #tpu.memory_space<vmem>>, %arg8: memref<1x1x32xf32, #tpu.memory_space<vmem>>, %arg9: memref<1x1x32xf32, #tpu.memory_space<vmem>>, %arg10: memref<1x1x32xf32, #tpu.memory_space<vmem>>, %arg11: memref<1x32x128xbf16, #tpu.memory_space<vmem>>, %arg12: memref<1x1x128xf32, #tpu.memory_space<vmem>>, %arg13: memref<1x128x32xbf16, #tpu.memory_space<vmem>>, %arg14: memref<1x1x32xf32, #tpu.memory_space<vmem>>, %arg15: memref<1x1x32xf32, #tpu.memory_space<vmem>>, %arg16: memref<1x1x32xf32, #tpu.memory_space<vmem>>, %arg17: memref<1x8x32xf32, #tpu.memory_space<vmem>>, %arg18: memref<2x8x32xf32, #tpu.memory_space<vmem>>) attributes {dimension_semantics = [#tpu.dimension_semantics<arbitrary>, #tpu.dimension_semantics<arbitrary>], iteration_bounds = array<i64: 2, 2>, scalar_prefetch = 0 : i64, scratch_operands = 1 : i64, tpu.core_type = #tpu.core_type<tc>, window_params = [{pipeline_mode = #tpu.pipeline_mode<synchronous>, transform_indices = @transform_0, window_bounds = array<i64: 2, 8, 32>}, {pipeline_mode = #tpu.pipeline_mode<synchronous>, transform_indices = @transform_1, window_bounds = array<i64: 1, 32>}, {pipeline_mode = #tpu.pipeline_mode<synchronous>, transform_indices = @transform_2, window_bounds = array<i64: 1, 32>}, {transform_indices = @transform_3, window_bounds = array<i64: 1, 4, 32, 24>}, {transform_indices = @transform_4, window_bounds = array<i64: 1, 4, 1, 24>}, {transform_indices = @transform_5, window_bounds = array<i64: 1, 4, 8, 32>}, {transform_indices = @transform_6, window_bounds = array<i64: 1, 1, 32>}, {transform_indices = @transform_7, window_bounds = array<i64: 1, 1, 32>}, {transform_indices = @transform_8, window_bounds = array<i64: 1, 1, 32>}, {transform_indices = @transform_9, window_bounds = array<i64: 1, 32, 128>}, {transform_indices = @transform_10, window_bounds = array<i64: 1, 1, 128>}, {transform_indices = @transform_11, window_bounds = array<i64: 1, 128, 32>}, {transform_indices = @transform_12, window_bounds = array<i64: 1, 1, 32>}, {transform_indices = @transform_13, window_bounds = array<i64: 1, 1, 32>}, {transform_indices = @transform_14, window_bounds = array<i64: 1, 1, 32>}, {transform_indices = @transform_15, window_bounds = array<i64: 1, 8, 32>}]} {
    %c0_i32 = arith.constant 0 : i32
    %0 = arith.cmpi eq, %arg0, %c0_i32 : i32
    %1 = arith.extui %0 : i1 to i32
    %c0_i32_0 = arith.constant 0 : i32
    %2 = arith.cmpi ne, %1, %c0_i32_0 : i32
    scf.if %2 {
      %128 = arith.index_cast %arg1 : i32 to index
      %c0_65 = arith.constant 0 : index
      %c0_66 = arith.constant 0 : index
      %129 = vector.load %arg2[%128, %c0_65, %c0_66] : memref<2x8x32xf32, #tpu.memory_space<vmem>>, vector<1x8x32xf32>
      %130 = vector.shape_cast %129 : vector<1x8x32xf32> to vector<8x32xf32>
      %c0_67 = arith.constant 0 : index
      %c0_68 = arith.constant 0 : index
      %131 = vector.load %arg3[%c0_67, %c0_68] : memref<1x32xf32, #tpu.memory_space<vmem>>, vector<1x32xf32>
      %c0_69 = arith.constant 0 : index
      %c0_70 = arith.constant 0 : index
      %132 = vector.load %arg4[%c0_69, %c0_70] : memref<1x32xf32, #tpu.memory_space<vmem>>, vector<1x32xf32>
      %cst_71 = arith.constant dense<0.000000e+00> : vector<8xf32>
      %133 = vector.multi_reduction <add>, %130, %cst_71 [1] : vector<8x32xf32> to vector<8xf32>
      %134 = vector.shape_cast %133 : vector<8xf32> to vector<8x1xf32>
      %cst_72 = arith.constant 3.200000e+01 : f32
      %135 = vector.broadcast %cst_72 : f32 to vector<8x1xf32>
      %136 = arith.divf %134, %135 : vector<8x1xf32>
      %137 = vector.broadcast %136 : vector<8x1xf32> to vector<8x32xf32>
      %138 = arith.subf %130, %137 : vector<8x32xf32>
      %139 = arith.mulf %138, %138 : vector<8x32xf32>
      %cst_73 = arith.constant dense<0.000000e+00> : vector<8xf32>
      %140 = vector.multi_reduction <add>, %139, %cst_73 [1] : vector<8x32xf32> to vector<8xf32>
      %141 = vector.shape_cast %140 : vector<8xf32> to vector<8x1xf32>
      %cst_74 = arith.constant 3.200000e+01 : f32
      %142 = vector.broadcast %cst_74 : f32 to vector<8x1xf32>
      %143 = arith.divf %141, %142 : vector<8x1xf32>
      %144 = vector.broadcast %136 : vector<8x1xf32> to vector<8x32xf32>
      %145 = arith.subf %130, %144 : vector<8x32xf32>
      %cst_75 = arith.constant 9.99999996E-13 : f32
      %146 = vector.broadcast %cst_75 : f32 to vector<8x1xf32>
      %147 = arith.addf %143, %146 : vector<8x1xf32>
      %148 = math.rsqrt %147 : vector<8x1xf32>
      %149 = vector.broadcast %148 : vector<8x1xf32> to vector<8x32xf32>
      %150 = arith.mulf %145, %149 : vector<8x32xf32>
      %151 = vector.broadcast %131 : vector<1x32xf32> to vector<8x32xf32>
      %152 = arith.mulf %150, %151 : vector<8x32xf32>
      %153 = vector.broadcast %132 : vector<1x32xf32> to vector<8x32xf32>
      %154 = arith.addf %152, %153 : vector<8x32xf32>
      %155 = arith.index_cast %arg1 : i32 to index
      %c0_76 = arith.constant 0 : index
      %c0_77 = arith.constant 0 : index
      %156 = vector.load %arg18[%155, %c0_76, %c0_77] : memref<2x8x32xf32, #tpu.memory_space<vmem>>, vector<1x8x32xf32>
      %157 = vector.shape_cast %156 : vector<1x8x32xf32> to vector<8x32xf32>
      %158 = vector.shape_cast %154 : vector<8x32xf32> to vector<1x8x32xf32>
      tpu.vector_store %arg18[%155, %c0_76, %c0_77], %158 {strides = array<i32>} : memref<2x8x32xf32, #tpu.memory_space<vmem>>, vector<1x8x32xf32>,
    } else {
    }
    %3 = arith.index_cast %arg1 : i32 to index
    %c0 = arith.constant 0 : index
    %c0_1 = arith.constant 0 : index
    %4 = vector.load %arg18[%3, %c0, %c0_1] : memref<2x8x32xf32, #tpu.memory_space<vmem>>, vector<1x8x32xf32>
    %5 = vector.shape_cast %4 : vector<1x8x32xf32> to vector<8x32xf32>
    %6 = arith.truncf %5 : vector<8x32xf32> to vector<8x32xbf16>
    %7 = vector.shape_cast %6 : vector<8x32xbf16> to vector<1x8x32xbf16>
    %8 = vector.broadcast %7 : vector<1x8x32xbf16> to vector<4x8x32xbf16>
    %c0_2 = arith.constant 0 : index
    %c0_3 = arith.constant 0 : index
    %c0_4 = arith.constant 0 : index
    %c0_5 = arith.constant 0 : index
    %9 = vector.load %arg5[%c0_2, %c0_3, %c0_4, %c0_5] : memref<1x4x32x24xbf16, #tpu.memory_space<vmem>>, vector<1x4x32x24xbf16>
    %10 = vector.shape_cast %9 : vector<1x4x32x24xbf16> to vector<4x32x24xbf16>
    "tpu.trace_start"() <{level = 10 : i32, message = "hsk,hkd->hsd"}> : () -> ()
    %cst = arith.constant dense<0.000000e+00> : vector<4x8x24xf32>
    %11 = tpu.matmul %8, %10, %cst {dimension_numbers = #tpu.dot_dimension_numbers<[2], [1], [1], [2], [0, 0, 0, 1, 1, 2], [0], [0]>} : vector<4x8x32xbf16>, vector<4x32x24xbf16>, vector<4x8x24xf32> -> vector<4x8x24xf32>
    "tpu.trace_stop"() : () -> ()
    %c0_6 = arith.constant 0 : index
    %c0_7 = arith.constant 0 : index
    %c0_8 = arith.constant 0 : index
    %c0_9 = arith.constant 0 : index
    %12 = vector.load %arg6[%c0_6, %c0_7, %c0_8, %c0_9] : memref<1x4x1x24xf32, #tpu.memory_space<vmem>>, vector<1x4x1x24xf32>
    %13 = vector.shape_cast %12 : vector<1x4x1x24xf32> to vector<4x1x24xf32>
    %14 = vector.broadcast %13 : vector<4x1x24xf32> to vector<4x8x24xf32>
    %15 = arith.addf %11, %14 : vector<4x8x24xf32>
    %16 = vector.extract_strided_slice %15 {offsets = [0, 0, 0], sizes = [4, 8, 8], strides = [1, 1, 1]} : vector<4x8x24xf32> to vector<4x8x8xf32>
    %17 = arith.truncf %16 : vector<4x8x8xf32> to vector<4x8x8xbf16>
    %18 = vector.extract_strided_slice %15 {offsets = [0, 0, 8], sizes = [4, 8, 8], strides = [1, 1, 1]} : vector<4x8x24xf32> to vector<4x8x8xf32>
    %19 = arith.truncf %18 : vector<4x8x8xf32> to vector<4x8x8xbf16>
    %20 = vector.extract_strided_slice %15 {offsets = [0, 0, 16], sizes = [4, 8, 8], strides = [1, 1, 1]} : vector<4x8x24xf32> to vector<4x8x8xf32>
    %21 = arith.truncf %20 : vector<4x8x8xf32> to vector<4x8x8xbf16>
    "tpu.trace_start"() <{level = 10 : i32, message = "hqd,hkd->hqk"}> : () -> ()
    %cst_10 = arith.constant dense<0.000000e+00> : vector<4x8x8xf32>
    %22 = tpu.matmul %17, %19, %cst_10 {dimension_numbers = #tpu.dot_dimension_numbers<[2], [2], [1], [1], [0, 0, 0, 1, 1, 1], [0], [0]>} : vector<4x8x8xbf16>, vector<4x8x8xbf16>, vector<4x8x8xf32> -> vector<4x8x8xf32>
    "tpu.trace_stop"() : () -> ()
    %cst_11 = arith.constant dense<0xFF800000> : vector<4x8xf32>
    %23 = vector.multi_reduction <maximumf>, %22, %cst_11 [2] : vector<4x8x8xf32> to vector<4x8xf32>
    %24 = vector.shape_cast %23 : vector<4x8xf32> to vector<4x8x1xf32>
    %25 = vector.broadcast %24 : vector<4x8x1xf32> to vector<4x8x8xf32>
    %26 = arith.subf %22, %25 : vector<4x8x8xf32>
    %27 = math.exp %26 : vector<4x8x8xf32>
    %cst_12 = arith.constant dense<0.000000e+00> : vector<4x8xf32>
    %28 = vector.multi_reduction <add>, %27, %cst_12 [2] : vector<4x8x8xf32> to vector<4x8xf32>
    %29 = vector.shape_cast %28 : vector<4x8xf32> to vector<4x8x1xf32>
    %30 = tpu.reciprocal %29 {approx = true} : vector<4x8x1xf32> -> vector<4x8x1xf32>
    %31 = vector.broadcast %30 : vector<4x8x1xf32> to vector<4x8x8xf32>
    %32 = arith.mulf %27, %31 : vector<4x8x8xf32>
    %33 = arith.truncf %32 : vector<4x8x8xf32> to vector<4x8x8xbf16>
    "tpu.trace_start"() <{level = 10 : i32, message = "hqk,hkd->hqd"}> : () -> ()
    %cst_13 = arith.constant dense<0.000000e+00> : vector<4x8x8xf32>
    %34 = tpu.matmul %33, %21, %cst_13 {dimension_numbers = #tpu.dot_dimension_numbers<[2], [1], [1], [2], [0, 0, 0, 1, 1, 2], [0], [0]>} : vector<4x8x8xbf16>, vector<4x8x8xbf16>, vector<4x8x8xf32> -> vector<4x8x8xf32>
    "tpu.trace_stop"() : () -> ()
    %35 = arith.truncf %34 : vector<4x8x8xf32> to vector<4x8x8xbf16>
    %c0_14 = arith.constant 0 : index
    %c0_15 = arith.constant 0 : index
    %c0_16 = arith.constant 0 : index
    %c0_17 = arith.constant 0 : index
    %36 = vector.load %arg7[%c0_14, %c0_15, %c0_16, %c0_17] : memref<1x4x8x32xbf16, #tpu.memory_space<vmem>>, vector<1x4x8x32xbf16>
    %37 = vector.shape_cast %36 : vector<1x4x8x32xbf16> to vector<4x8x32xbf16>
    "tpu.trace_start"() <{level = 10 : i32, message = "hsd,hdk->hsk"}> : () -> ()
    %cst_18 = arith.constant dense<0.000000e+00> : vector<4x8x32xf32>
    %38 = tpu.matmul %35, %37, %cst_18 {dimension_numbers = #tpu.dot_dimension_numbers<[2], [1], [1], [2], [0, 0, 0, 1, 1, 2], [0], [0]>} : vector<4x8x8xbf16>, vector<4x8x32xbf16>, vector<4x8x32xf32> -> vector<4x8x32xf32>
    "tpu.trace_stop"() : () -> ()
    %cst_19 = arith.constant dense<0.000000e+00> : vector<8x32xf32>
    %39 = vector.multi_reduction <add>, %38, %cst_19 [0] : vector<4x8x32xf32> to vector<8x32xf32>
    %c0_20 = arith.constant 0 : index
    %c0_21 = arith.constant 0 : index
    %c0_22 = arith.constant 0 : index
    %40 = vector.load %arg8[%c0_20, %c0_21, %c0_22] : memref<1x1x32xf32, #tpu.memory_space<vmem>>, vector<1x1x32xf32>
    %41 = vector.shape_cast %40 : vector<1x1x32xf32> to vector<1x32xf32>
    %42 = vector.broadcast %41 : vector<1x32xf32> to vector<8x32xf32>
    %43 = arith.addf %39, %42 : vector<8x32xf32>
    %44 = arith.addf %5, %43 : vector<8x32xf32>
    %c0_23 = arith.constant 0 : index
    %c0_24 = arith.constant 0 : index
    %c0_25 = arith.constant 0 : index
    %45 = vector.load %arg9[%c0_23, %c0_24, %c0_25] : memref<1x1x32xf32, #tpu.memory_space<vmem>>, vector<1x1x32xf32>
    %46 = vector.shape_cast %45 : vector<1x1x32xf32> to vector<1x32xf32>
    %c0_26 = arith.constant 0 : index
    %c0_27 = arith.constant 0 : index
    %c0_28 = arith.constant 0 : index
    %47 = vector.load %arg10[%c0_26, %c0_27, %c0_28] : memref<1x1x32xf32, #tpu.memory_space<vmem>>, vector<1x1x32xf32>
    %48 = vector.shape_cast %47 : vector<1x1x32xf32> to vector<1x32xf32>
    %cst_29 = arith.constant dense<0.000000e+00> : vector<8xf32>
    %49 = vector.multi_reduction <add>, %44, %cst_29 [1] : vector<8x32xf32> to vector<8xf32>
    %50 = vector.shape_cast %49 : vector<8xf32> to vector<8x1xf32>
    %cst_30 = arith.constant 3.200000e+01 : f32
    %51 = vector.broadcast %cst_30 : f32 to vector<8x1xf32>
    %52 = arith.divf %50, %51 : vector<8x1xf32>
    %53 = vector.broadcast %52 : vector<8x1xf32> to vector<8x32xf32>
    %54 = arith.subf %44, %53 : vector<8x32xf32>
    %55 = arith.mulf %54, %54 : vector<8x32xf32>
    %cst_31 = arith.constant dense<0.000000e+00> : vector<8xf32>
    %56 = vector.multi_reduction <add>, %55, %cst_31 [1] : vector<8x32xf32> to vector<8xf32>
    %57 = vector.shape_cast %56 : vector<8xf32> to vector<8x1xf32>
    %cst_32 = arith.constant 3.200000e+01 : f32
    %58 = vector.broadcast %cst_32 : f32 to vector<8x1xf32>
    %59 = arith.divf %57, %58 : vector<8x1xf32>
    %60 = vector.broadcast %52 : vector<8x1xf32> to vector<8x32xf32>
    %61 = arith.subf %44, %60 : vector<8x32xf32>
    %cst_33 = arith.constant 9.99999996E-13 : f32
    %62 = vector.broadcast %cst_33 : f32 to vector<8x1xf32>
    %63 = arith.addf %59, %62 : vector<8x1xf32>
    %64 = math.rsqrt %63 : vector<8x1xf32>
    %65 = vector.broadcast %64 : vector<8x1xf32> to vector<8x32xf32>
    %66 = arith.mulf %61, %65 : vector<8x32xf32>
    %67 = vector.broadcast %46 : vector<1x32xf32> to vector<8x32xf32>
    %68 = arith.mulf %66, %67 : vector<8x32xf32>
    %69 = vector.broadcast %48 : vector<1x32xf32> to vector<8x32xf32>
    %70 = arith.addf %68, %69 : vector<8x32xf32>
    %71 = arith.truncf %70 : vector<8x32xf32> to vector<8x32xbf16>
    %c0_34 = arith.constant 0 : index
    %c0_35 = arith.constant 0 : index
    %c0_36 = arith.constant 0 : index
    %72 = vector.load %arg11[%c0_34, %c0_35, %c0_36] : memref<1x32x128xbf16, #tpu.memory_space<vmem>>, vector<1x32x128xbf16>
    %73 = vector.shape_cast %72 : vector<1x32x128xbf16> to vector<32x128xbf16>
    %cst_37 = arith.constant dense<0.000000e+00> : vector<8x128xf32>
    %74 = tpu.matmul %71, %73, %cst_37 {dimension_numbers = #tpu.dot_dimension_numbers<[1], [0], [0], [1], [0, 0, 1, 1], [], []>} : vector<8x32xbf16>, vector<32x128xbf16>, vector<8x128xf32> -> vector<8x128xf32>
    %c0_38 = arith.constant 0 : index
    %c0_39 = arith.constant 0 : index
    %c0_40 = arith.constant 0 : index
    %75 = vector.load %arg12[%c0_38, %c0_39, %c0_40] : memref<1x1x128xf32, #tpu.memory_space<vmem>>, vector<1x1x128xf32>
    %76 = vector.shape_cast %75 : vector<1x1x128xf32> to vector<1x128xf32>
    %77 = vector.broadcast %76 : vector<1x128xf32> to vector<8x128xf32>
    %78 = arith.addf %74, %77 : vector<8x128xf32>
    %cst_41 = arith.constant 5.000000e-01 : f32
    %79 = vector.broadcast %cst_41 : f32 to vector<8x128xf32>
    %80 = arith.mulf %79, %78 : vector<8x128xf32>
    %cst_42 = arith.constant 0.707106769 : f32
    %81 = vector.broadcast %cst_42 : f32 to vector<8x128xf32>
    %82 = arith.mulf %78, %81 : vector<8x128xf32>
    %83 = math.erf %82 : vector<8x128xf32>
    %cst_43 = arith.constant 1.000000e+00 : f32
    %84 = vector.broadcast %cst_43 : f32 to vector<8x128xf32>
    %85 = arith.addf %84, %83 : vector<8x128xf32>
    %86 = arith.mulf %80, %85 : vector<8x128xf32>
    %87 = arith.truncf %86 : vector<8x128xf32> to vector<8x128xbf16>
    %c0_44 = arith.constant 0 : index
    %c0_45 = arith.constant 0 : index
    %c0_46 = arith.constant 0 : index
    %88 = vector.load %arg13[%c0_44, %c0_45, %c0_46] : memref<1x128x32xbf16, #tpu.memory_space<vmem>>, vector<1x128x32xbf16>
    %89 = vector.shape_cast %88 : vector<1x128x32xbf16> to vector<128x32xbf16>
    %cst_47 = arith.constant dense<0.000000e+00> : vector<8x32xf32>
    %90 = tpu.matmul %87, %89, %cst_47 {dimension_numbers = #tpu.dot_dimension_numbers<[1], [0], [0], [1], [0, 0, 1, 1], [], []>} : vector<8x128xbf16>, vector<128x32xbf16>, vector<8x32xf32> -> vector<8x32xf32>
    %c0_48 = arith.constant 0 : index
    %c0_49 = arith.constant 0 : index
    %c0_50 = arith.constant 0 : index
    %91 = vector.load %arg14[%c0_48, %c0_49, %c0_50] : memref<1x1x32xf32, #tpu.memory_space<vmem>>, vector<1x1x32xf32>
    %92 = vector.shape_cast %91 : vector<1x1x32xf32> to vector<1x32xf32>
    %93 = vector.broadcast %92 : vector<1x32xf32> to vector<8x32xf32>
    %94 = arith.addf %90, %93 : vector<8x32xf32>
    %95 = arith.addf %70, %94 : vector<8x32xf32>
    %c0_51 = arith.constant 0 : index
    %c0_52 = arith.constant 0 : index
    %c0_53 = arith.constant 0 : index
    %96 = vector.load %arg15[%c0_51, %c0_52, %c0_53] : memref<1x1x32xf32, #tpu.memory_space<vmem>>, vector<1x1x32xf32>
    %97 = vector.shape_cast %96 : vector<1x1x32xf32> to vector<1x32xf32>
    %c0_54 = arith.constant 0 : index
    %c0_55 = arith.constant 0 : index
    %c0_56 = arith.constant 0 : index
    %98 = vector.load %arg16[%c0_54, %c0_55, %c0_56] : memref<1x1x32xf32, #tpu.memory_space<vmem>>, vector<1x1x32xf32>
    %99 = vector.shape_cast %98 : vector<1x1x32xf32> to vector<1x32xf32>
    %cst_57 = arith.constant dense<0.000000e+00> : vector<8xf32>
    %100 = vector.multi_reduction <add>, %95, %cst_57 [1] : vector<8x32xf32> to vector<8xf32>
    %101 = vector.shape_cast %100 : vector<8xf32> to vector<8x1xf32>
    %cst_58 = arith.constant 3.200000e+01 : f32
    %102 = vector.broadcast %cst_58 : f32 to vector<8x1xf32>
    %103 = arith.divf %101, %102 : vector<8x1xf32>
    %104 = vector.broadcast %103 : vector<8x1xf32> to vector<8x32xf32>
    %105 = arith.subf %95, %104 : vector<8x32xf32>
    %106 = arith.mulf %105, %105 : vector<8x32xf32>
    %cst_59 = arith.constant dense<0.000000e+00> : vector<8xf32>
    %107 = vector.multi_reduction <add>, %106, %cst_59 [1] : vector<8x32xf32> to vector<8xf32>
    %108 = vector.shape_cast %107 : vector<8xf32> to vector<8x1xf32>
    %cst_60 = arith.constant 3.200000e+01 : f32
    %109 = vector.broadcast %cst_60 : f32 to vector<8x1xf32>
    %110 = arith.divf %108, %109 : vector<8x1xf32>
    %111 = vector.broadcast %103 : vector<8x1xf32> to vector<8x32xf32>
    %112 = arith.subf %95, %111 : vector<8x32xf32>
    %cst_61 = arith.constant 9.99999996E-13 : f32
    %113 = vector.broadcast %cst_61 : f32 to vector<8x1xf32>
    %114 = arith.addf %110, %113 : vector<8x1xf32>
    %115 = math.rsqrt %114 : vector<8x1xf32>
    %116 = vector.broadcast %115 : vector<8x1xf32> to vector<8x32xf32>
    %117 = arith.mulf %112, %116 : vector<8x32xf32>
    %118 = vector.broadcast %97 : vector<1x32xf32> to vector<8x32xf32>
    %119 = arith.mulf %117, %118 : vector<8x32xf32>
    %120 = vector.broadcast %99 : vector<1x32xf32> to vector<8x32xf32>
    %121 = arith.addf %119, %120 : vector<8x32xf32>
    %c1_i32 = arith.constant 1 : i32
    %122 = arith.cmpi slt, %arg0, %c1_i32 : i32
    %123 = arith.extui %122 : i1 to i32
    %c0_i32_62 = arith.constant 0 : i32
    %124 = arith.cmpi ne, %123, %c0_i32_62 : i32
    scf.if %124 {
      %128 = arith.index_cast %arg1 : i32 to index
      %c0_65 = arith.constant 0 : index
      %c0_66 = arith.constant 0 : index
      %129 = vector.load %arg18[%128, %c0_65, %c0_66] : memref<2x8x32xf32, #tpu.memory_space<vmem>>, vector<1x8x32xf32>
      %130 = vector.shape_cast %129 : vector<1x8x32xf32> to vector<8x32xf32>
      %131 = vector.shape_cast %121 : vector<8x32xf32> to vector<1x8x32xf32>
      tpu.vector_store %arg18[%128, %c0_65, %c0_66], %131 {strides = array<i32>} : memref<2x8x32xf32, #tpu.memory_space<vmem>>, vector<1x8x32xf32>,
    } else {
    }
    %c1_i32_63 = arith.constant 1 : i32
    %125 = arith.cmpi eq, %arg0, %c1_i32_63 : i32
    %126 = arith.extui %125 : i1 to i32
    %c0_i32_64 = arith.constant 0 : i32
    %127 = arith.cmpi ne, %126, %c0_i32_64 : i32
    scf.if %127 {
      %c0_65 = arith.constant 0 : index
      %c0_66 = arith.constant 0 : index
      %c0_67 = arith.constant 0 : index
      %128 = vector.load %arg17[%c0_65, %c0_66, %c0_67] : memref<1x8x32xf32, #tpu.memory_space<vmem>>, vector<1x8x32xf32>
      %129 = vector.shape_cast %128 : vector<1x8x32xf32> to vector<8x32xf32>
      %130 = vector.shape_cast %121 : vector<8x32xf32> to vector<1x8x32xf32>
      tpu.vector_store %arg17[%c0_65, %c0_66, %c0_67], %130 {strides = array<i32>} : memref<1x8x32xf32, #tpu.memory_space<vmem>>, vector<1x8x32xf32>,
    } else {
    }
    return
  }
  func.func @transform_0(%arg0: i32, %arg1: i32) -> (i32, i32, i32) {
    %c0_i32 = arith.constant 0 : i32
    %c0_i32_0 = arith.constant 0 : i32
    %c0_i32_1 = arith.constant 0 : i32
    %c0_i32_2 = arith.constant 0 : i32
    return %c0_i32, %c0_i32_0, %c0_i32_1 : i32, i32, i32
  }
  func.func @transform_1(%arg0: i32, %arg1: i32) -> (i32, i32) {
    %c0_i32 = arith.constant 0 : i32
    %c0_i32_0 = arith.constant 0 : i32
    %c0_i32_1 = arith.constant 0 : i32
    return %c0_i32, %c0_i32_0 : i32, i32
  }
  func.func @transform_2(%arg0: i32, %arg1: i32) -> (i32, i32) {
    %c0_i32 = arith.constant 0 : i32
    %c0_i32_0 = arith.constant 0 : i32
    %c0_i32_1 = arith.constant 0 : i32
    return %c0_i32, %c0_i32_0 : i32, i32
  }
  func.func @transform_3(%arg0: i32, %arg1: i32) -> (i32, i32, i32, i32) {
    %c0_i32 = arith.constant 0 : i32
    %c0_i32_0 = arith.constant 0 : i32
    %c0_i32_1 = arith.constant 0 : i32
    %c0_i32_2 = arith.constant 0 : i32
    return %arg0, %c0_i32, %c0_i32_0, %c0_i32_1 : i32, i32, i32, i32
  }
  func.func @transform_4(%arg0: i32, %arg1: i32) -> (i32, i32, i32, i32) {
    %c0_i32 = arith.constant 0 : i32
    %c0_i32_0 = arith.constant 0 : i32
    %c0_i32_1 = arith.constant 0 : i32
    %c0_i32_2 = arith.constant 0 : i32
    return %arg0, %c0_i32, %c0_i32_0, %c0_i32_1 : i32, i32, i32, i32
  }
  func.func @transform_5(%arg0: i32, %arg1: i32) -> (i32, i32, i32, i32) {
    %c0_i32 = arith.constant 0 : i32
    %c0_i32_0 = arith.constant 0 : i32
    %c0_i32_1 = arith.constant 0 : i32
    %c0_i32_2 = arith.constant 0 : i32
    return %arg0, %c0_i32, %c0_i32_0, %c0_i32_1 : i32, i32, i32, i32
  }
  func.func @transform_6(%arg0: i32, %arg1: i32) -> (i32, i32, i32) {
    %c0_i32 = arith.constant 0 : i32
    %c0_i32_0 = arith.constant 0 : i32
    %c0_i32_1 = arith.constant 0 : i32
    return %arg0, %c0_i32, %c0_i32_0 : i32, i32, i32
  }
  func.func @transform_7(%arg0: i32, %arg1: i32) -> (i32, i32, i32) {
    %c0_i32 = arith.constant 0 : i32
    %c0_i32_0 = arith.constant 0 : i32
    %c0_i32_1 = arith.constant 0 : i32
    return %arg0, %c0_i32, %c0_i32_0 : i32, i32, i32
  }
  func.func @transform_8(%arg0: i32, %arg1: i32) -> (i32, i32, i32) {
    %c0_i32 = arith.constant 0 : i32
    %c0_i32_0 = arith.constant 0 : i32
    %c0_i32_1 = arith.constant 0 : i32
    return %arg0, %c0_i32, %c0_i32_0 : i32, i32, i32
  }
  func.func @transform_9(%arg0: i32, %arg1: i32) -> (i32, i32, i32) {
    %c0_i32 = arith.constant 0 : i32
    %c0_i32_0 = arith.constant 0 : i32
    %c0_i32_1 = arith.constant 0 : i32
    return %arg0, %c0_i32, %c0_i32_0 : i32, i32, i32
  }
  func.func @transform_10(%arg0: i32, %arg1: i32) -> (i32, i32, i32) {
    %c0_i32 = arith.constant 0 : i32
    %c0_i32_0 = arith.constant 0 : i32
    %c0_i32_1 = arith.constant 0 : i32
    return %arg0, %c0_i32, %c0_i32_0 : i32, i32, i32
  }
  func.func @transform_11(%arg0: i32, %arg1: i32) -> (i32, i32, i32) {
    %c0_i32 = arith.constant 0 : i32
    %c0_i32_0 = arith.constant 0 : i32
    %c0_i32_1 = arith.constant 0 : i32
    return %arg0, %c0_i32, %c0_i32_0 : i32, i32, i32
  }
  func.func @transform_12(%arg0: i32, %arg1: i32) -> (i32, i32, i32) {
    %c0_i32 = arith.constant 0 : i32
    %c0_i32_0 = arith.constant 0 : i32
    %c0_i32_1 = arith.constant 0 : i32
    return %arg0, %c0_i32, %c0_i32_0 : i32, i32, i32
  }
  func.func @transform_13(%arg0: i32, %arg1: i32) -> (i32, i32, i32) {
    %c0_i32 = arith.constant 0 : i32
    %c0_i32_0 = arith.constant 0 : i32
    %c0_i32_1 = arith.constant 0 : i32
    return %arg0, %c0_i32, %c0_i32_0 : i32, i32, i32
  }
  func.func @transform_14(%arg0: i32, %arg1: i32) -> (i32, i32, i32) {
    %c0_i32 = arith.constant 0 : i32
    %c0_i32_0 = arith.constant 0 : i32
    %c0_i32_1 = arith.constant 0 : i32
    return %arg0, %c0_i32, %c0_i32_0 : i32, i32, i32
  }
  func.func @transform_15(%arg0: i32, %arg1: i32) -> (i32, i32, i32) {
    %c0_i32 = arith.constant 0 : i32
    %c0_i32_0 = arith.constant 0 : i32
    %c0_i32_1 = arith.constant 0 : i32
    return %arg1, %c0_i32, %c0_i32_0 : i32, i32, i32
  }
}

</mosaic_0001>

<bundles_post_ra>
// kernel: bert_encoder_forward.1
= control target key start
LH: loop header
LB: loop body
LE: loop exit
PB: predicated region body
PF: predicated region fallthrough
CT: control target
= control target key end

     0   :  { %s2428_s0 = inlined_call_operand.vmem [shape: f32[2,8,32], index: 0, kind: input, shape index: {}]   ;;  %s2429_s1 = inlined_call_operand.vmem [shape: f32[1,32], index: 1, kind: input, shape index: {}]   ;;  %s2430_s2 = inlined_call_operand.vmem [shape: f32[1,32], index: 2, kind: input, shape index: {}]   ;;  %s2431_s3 = inlined_call_operand.vmem [shape: bf16[2,4,32,24], index: 3, kind: input, shape index: {}]   ;;  %s2432_s4 = inlined_call_operand.vmem [shape: f32[2,4,1,24], index: 4, kind: input, shape index: {}]   ;;  %s2433_s5 = inlined_call_operand.vmem [shape: bf16[2,4,8,32], index: 5, kind: input, shape index: {}]   ;;  %s2434_s6 = inlined_call_operand.vmem [shape: f32[2,1,32], index: 6, kind: input, shape index: {}]   ;;  %s2435_s7 = inlined_call_operand.vmem [shape: f32[2,1,32], index: 7, kind: input, shape index: {}]   ;;  %s2436_s8 = inlined_call_operand.vmem [shape: f32[2,1,32], index: 8, kind: input, shape index: {}]   ;;  %s2437_s9 = inlined_call_operand.vmem [shape: bf16[2,32,128], index: 9, kind: input, shape index: {}]   ;;  %s2438_s10 = inlined_call_operand.vmem [shape: f32[2,1,128], index: 10, kind: input, shape index: {}]   ;;  %s2439_s11 = inlined_call_operand.vmem [shape: bf16[2,128,32], index: 11, kind: input, shape index: {}]   ;;  %s2440_s12 = inlined_call_operand.vmem [shape: f32[2,1,32], index: 12, kind: input, shape index: {}]   ;;  %s2441_s13 = inlined_call_operand.vmem [shape: f32[2,1,32], index: 13, kind: input, shape index: {}]   ;;  %s2442_s14 = inlined_call_operand.vmem [shape: f32[2,1,32], index: 14, kind: input, shape index: {}]   ;;  %s2443_s15 = inlined_call_operand.hbm [shape: f32[2,8,32], index: 15, kind: output, shape index: {}]  }
   0x1   :  { %2460 = sst [smem:[#allocation19_spill]] %s2428_s0 }
   0x2   :  { %2461 = sst [smem:[#allocation20_spill]] %s2429_s1 }
   0x3   :  { %2462 = sst [smem:[#allocation21_spill]] %s2430_s2 }
   0x4   :  { %2463 = sst [smem:[#allocation22_spill]] %s2431_s3 }
   0x5   :  { %2464 = sst [smem:[#allocation23_spill]] %s2432_s4 }
   0x6   :  { %2465 = sst [smem:[#allocation24_spill]] %s2433_s5 }
   0x7   :  { %2466 = sst [smem:[#allocation25_spill]] %s2437_s9 }
   0x8   :  { %2467 = sst [smem:[#allocation26_spill]] %s2443_s15 }
   0x9   :  { %20 = vsyncpa [#allocation4], 0 }
   0xa   :  { %22 = vsyncpa [#allocation4 + $0x1], 0  ;;  %s2081_s18 = smov 0   ;;  %s2083_s19 = smov 0  }
   0xb   :  { %s2085_s20 = smov 0   ;;  %s2087_s21 = smov 0  }
   0xc   :  { %s2089_s22 = smov 0   ;;  %s2091_s23 = smov 0  }
   0xd   :  { %s2093_s24 = smov 0   ;;  %s2095_s25 = smov 0  }
   0xe LB: > { %2468 = sst [smem:[#allocation6_spill]] %s1967_s18  ;;  %s1649_s26 = sadd.s32 4294967295, %s1995_s25   ;;  %s1995_s25 = sphi %s2095_s25, %s28_s25   ;;  %s1991_s24 = sphi %s2093_s24, %s2512_s24   ;;  %s1987_s23 = sphi %s2091_s23, %s2511_s23   ;;  %s1983_s22 = sphi %s2089_s22, %s2510_s22   ;;  %s1979_s21 = sphi %s2087_s21, %s2509_s21   ;;  %s1975_s20 = sphi %s2085_s20, %s2508_s20   ;;  %s1971_s19 = sphi %s2083_s19, %s2507_s19   ;;  %s1967_s18 = sphi %s2081_s18, %s2506_s18  }
   0xf   : > { %2469 = sst [smem:[#allocation7_spill]] %s1971_s19  ;;  %s1650_s27 = sadd.s32 4294967294, %s1995_s25  }
  0x10   : > { %2470 = sst [smem:[#allocation8_spill]] %s1975_s20  ;;  %s37_s28 = sadd.s32 1, %s1987_s23 }
  0x11   : > { %2471 = sst [smem:[#allocation9_spill]] %s1979_s21  ;;  %s40_s29 = sadd.s32 1, %s1991_s24 }
  0x12   : > { %2472 = sst [smem:[#allocation10_spill]] %s1983_s22  ;;  %p38_p0 = scmp.ge.s32.totalorder %s37_s28, 2 }
  0x13   : > { %2473 = sst [smem:[#allocation11_spill]] %s1987_s23  ;;  %s422_s30 = sadd.s32 1, %s1975_s20 }
  0x14   : > { %2474 = sst [smem:[#allocation12_spill]] %s1991_s24  ;;  %p432_p1 = scmp.ne.s32.totalorder %s1975_s20, %s1971_s19 }
  0x15   : > { %2475 = sst [smem:[#allocation13_spill]] %s1995_s25  ;;  %p433_p2 = scmp.eq.s32.totalorder %s1649_s26, 3 }
  0x16   : > { %s2514_s28 = smov (%p38_p0, %s37_s28), 0  ;;  %s2516_s29 = smov (!%p38_p0, %s40_s29), %s1991_s24 }
  0x17   : > { %2476 = sst [smem:[#allocation14_spill]] %s2514_s28  ;;  %s419_s16 = ssub.s32 %s1987_s23, %s2514_s28 }
  0x18   : > { %p2133_p3 = por %p433_p2, %p432_p1  ;;  %p42_p4 = scmp.ge.s32.totalorder %s2516_s29, 2 }
  0x19   : > { %p420_p5 = scmp.eq.s32.totalorder %s419_s16, 0  ;;  %p438_p6 = scmp.ne.s32.totalorder %s1971_s19, %s1967_s18 }
  0x1a   : > { %s2477_s17 = scalar_select %p2133_p3, 1, 0 }
  0x1b   : > { %p439_p7 = scmp.eq.s32.totalorder %s1650_s27, 3  ;;  %s2518_s29 = smov (%p42_p4, %s2516_s29), 0 }
  0x1c   : > { %2478 = sst [smem:[#allocation15_spill]] %s2477_s17  ;;  %p1653_p9 = scmp.ge.s32.totalorder %s1995_s25, 1 }
  0x1d   : > { %2479 = sst [smem:[#allocation16_spill]] %s2518_s29  ;;  %p2144_p8 = por %p439_p7, %p438_p6 }
  0x1e   : > { %s2142_s15 = scalar_select %p420_p5, %s1975_s20, %s422_s30  }
  0x1f   : > { %s2481_s2 = scalar_select %p2144_p8, 1, 0 }
  0x20   : > { %2480 = sst [smem:[#allocation17_spill]] %s2142_s15  ;;  %p547_p10 = scmp.lt.s32.totalorder %s1995_s25, 5 }
  0x21   : > { %2482 = sst [smem:[#allocation18_spill]] %s2481_s2 }
  0x22   : > { %p548_p11 = pnand %p1653_p9, %p547_p10 }
  0x23   : > { %s2447_s26 = sand.u32 (!%p548_p11), 1, %s1971_s19   ;;  %p635_p12 = scmp.lt.s32.totalorder (!%p548_p11), %s1983_s22, 1 }
  0x24   : > { %551 = sbr.rel (%p548_p11) target bundleno = 2236 (0x8bc), region = 80  ;;  %s2154_s27 = sshll.u32 (!%p548_p11), %s2447_s26, 3 }
  0x25   : > { %s2483_s3 = sld [smem:[#allocation22_spill]] (!%p548_p11) }
  0x26   : > { %s2484_s4 = sld [smem:[#allocation23_spill]] (!%p548_p11) }
  0x27   : > { %s2485_s5 = sld [smem:[#allocation24_spill]] (!%p548_p11) }
  0x28   : > { %s2486_s9 = sld [smem:[#allocation25_spill]] (!%p548_p11) }
  0x29   : > { %s2157_s16 = scalar_select %p635_p12, %s1983_s22, 1 }
  0x2a   : > { %s2487_s18 = sld [smem:[#allocation10_spill]] }
  0x2b   : > { %s1763_s30 = sshll.u32 %s2157_s16, 6  ;;  %s1657_s29 = sshll.u32 %s2157_s16, 2 }
  0x2c   : > { %s2164_s26 = scalar_lea.vmem %s2483_s3, %s1763_s30  ;;  %s2169_s20 = scalar_lea.vmem %s2484_s4, %s1657_s29 }
  0x2d   : > { %s1764_s2 = sshll.u32 %s2157_s16, 4  ;;  %s665_s17 = scalar_lea.vmem %s2438_s10, %s2157_s16 }
  0x2e   : > { %s2179_s0 = scalar_lea.vmem %s2485_s5, %s1764_s2  ;;  %s2192_s4 = scalar_lea.vmem %s2486_s9, %s1764_s2 }
  0x2f   : > { %s2201_s5 = scalar_lea.vmem %s2439_s11, %s1763_s30  ;;  %s673_s24 = scalar_lea.vmem %s2440_s12, %s2157_s16 }
  0x30   : > { %s676_s15 = scalar_lea.vmem %s2441_s13, %s2157_s16  ;;  %s679_s29 = scalar_lea.vmem %s2442_s14, %s2157_s16 }
  0x31   : > { %s634_s9 = scalar_lea.vmem [#allocation3], %s2154_s27  ;;  %p1664_p13 = scmp.ne.s32.totalorder %s2487_s18, 0 }
  0x32   : > { %s2488_s25 = sld [smem:[#allocation9_spill]] (!%p1664_p13) }
  0x33   : > { %684 = sbr.rel (%p1664_p13) target bundleno = 328 (0x148), region = 84  ;;  %s2489_s21 = sld [smem:[#allocation19_spill]] (!%p1664_p13) }
  0x34   : > { %s2490_s23 = sld [smem:[#allocation20_spill]] (!%p1664_p13) }
  0x35   : > { %s2491_s1 = sld [smem:[#allocation21_spill]] (!%p1664_p13) }
  0x38   : > { %s1665_s30 = sshll.u32 %s2488_s25, 3  ;;  %vm690_vm0 = vcmask 261120   ;;  %v1997_v2 = vmov 32.0  }
  0x39   : > { %s686_s22 = scalar_lea.vmem %s2489_s21, %s1665_s30  ;;  %1862 = vrcp.f32 %v1997_v2  ;;  %s728_s19 = scalar_lea.vmem [#allocation2], %s1665_s30 }
  0x3a   : > { %v687_v0 = vld [vmem:[%s686_s22] sm:$0xff] }
  0x3b   : > { %v691_v1 = vsel %vm690_vm0, %v687_v0, 0.0  ;;  %v1860_v23 = vld [vmem:[%s2490_s23] ss:$0 sm:$0xff] }
  0x3c   : > { %692 = vadd.xlane.f32.xlu0 %v691_v1  ;;  %v1861_v25 = vld [vmem:[%s2491_s1] ss:$0 sm:$0xff] }
  0x3f   : > { %v1863_v3 = vpop.eup %1862 }
  0x40   : > { %v695_v4 = vmul.f32 32.0, %v1863_v3  ;;  %vm699_vm1 = vweird.f32 %v1863_v3 }
  0x42   : > { %v696_v5 = vsub.f32 1.0, %v695_v4 }
  0x44   : > { %v697_v6 = vmul.f32 %v1863_v3, %v696_v5 }
  0x46   : > { %v698_v7 = vadd.f32 %v1863_v3, %v697_v6 }
  0x48   : > { %v700_v8 = vsel %vm699_vm1, %v1863_v3, %v698_v7 }
  0xaf   : > { %v693_v9 = vpop.xlane.xlu0 %692 }
  0xb0   : > { %v701_v10 = vmul.f32 %v700_v8, %v693_v9 }
  0xb2   : > { %v702_v11 = vsub.f32 %v687_v0, %v701_v10 }
  0xb4   : > { %v703_v12 = vmul.f32 %v702_v11, %v702_v11 }
  0xb6   : > { %v704_v13 = vsel %vm690_vm0, %v703_v12, 0.0 }
  0xb7   : > { %705 = vadd.xlane.f32.xlu0 %v704_v13 }
 0x12a   : > { %v706_v14 = vpop.xlane.xlu0 %705 }
 0x12b   : > { %v707_v15 = vmul.f32 %v706_v14, %v700_v8 }
 0x12d   : > { %v708_v16 = vadd.f32 1e-12, %v707_v15 }
 0x12f   : > { %1864 = vrsqrt.f32 %v708_v16  ;;  %vm715_vm3 = vweird.f32 %v708_v16 }
 0x135   : > { %v1865_v17 = vpop.eup %1864 }
 0x136   : > { %v710_v18 = vmul.f32 %v1865_v17, %v708_v16  ;;  %vm716_vm2 = vweird.f32 %v1865_v17 }
 0x137   : > { %vm717_vm4 = vmor %vm715_vm3, %vm716_vm2 }
 0x138   : > { %v711_v19 = vmul.f32 %v1865_v17, %v710_v18 }
 0x13a   : > { %v712_v20 = vmul.f32 0.5, %v711_v19 }
 0x13c   : > { %v713_v21 = vsub.f32 1.5, %v712_v20 }
 0x13e   : > { %v714_v22 = vmul.f32 %v1865_v17, %v713_v21 }
 0x140   : > { %v718_v24 = vsel %vm717_vm4, %v1865_v17, %v714_v22 }
 0x141   : > { %v719_v26 = vmul.f32 %v718_v24, %v702_v11 }
 0x143   : > { %v723_v27 = vmul.f32 %v1860_v23, %v719_v26 }
 0x145   : > { %v727_v28 = vadd.f32 %v1861_v25, %v723_v27 }
 0x147   : > { %729 = vst.msk [vmem:[%s728_s19] sm:$0xff] %vm690_vm0, %v727_v28 }
 0x148 PF: > { %s2492_s21 = sld [smem:[#allocation9_spill]]  ;;  %v1768_v29 = vld [vmem:[%s2164_s26 + $0x8] sm:$0xff]  ;;  %v1770_v30 = vld [vmem:[%s2164_s26 + $0x18] sm:$0xff]  ;;  %v1767_v31 = vld [vmem:[%s2164_s26] sm:$0xff]  ;;  %vm778_vm5 = vcmask 261120   ;;  %vm879_vm6 = vcmask 64512   ;;  %s2493_s3 = scalar_lea.vmem %s2434_s6, %s2157_s16 }
 0x149   : > { %v1774_v32 = vld [vmem:[%s2164_s26 + $0x38] sm:$0xff]  ;;  %788 = vmatpush.bf16.msra.mxu0 %v1768_v29  ;;  %813 = vmatpush.bf16.msra.mxu2 %v1770_v30  ;;  %v1769_v33 = vld [vmem:[%s2164_s26 + $0x10] sm:$0xff]  ;;  %v1772_v35 = vld [vmem:[%s2164_s26 + $0x28] sm:$0xff]  ;;  %vm1024_vm7 = vcmask 1043456   ;;  %s2494_s23 = scalar_lea.vmem %s2435_s7, %s2157_s16  ;;  %s2495_s1 = scalar_lea.vmem %s2436_s8, %s2157_s16 }
 0x14a   : > { %863 = vmatpush.bf16.msra.mxu3 %v1774_v32  ;;  %v1773_v36 = vld [vmem:[%s2164_s26 + $0x30] sm:$0xff]  ;;  %v1771_v38 = vld [vmem:[%s2164_s26 + $0x20] sm:$0xff]  ;;  %s1998_s26 = smov 120   ;;  %s2496_s30 = sld [smem:[#allocation10_spill]] }
 0x14b   : > { %v1866_v39 = vld [vmem:[%s2169_s20] ss:$0 sm:$0xff]  ;;  %v1867_v43 = vld [vmem:[%s2169_s20 + $0x1] ss:$0 sm:$0xff]  ;;  %v1868_v55 = vld [vmem:[%s2169_s20 + $0x2] ss:$0 sm:$0xff] }
 0x14c   : > { %v1869_v56 = vld [vmem:[%s2169_s20 + $0x3] ss:$0 sm:$0xff]  ;;  %s1999_s20 = smov 112  }
 0x14d   : > { %789 = vmatpush.bf16.msra.mxu0 %v1767_v31  ;;  %814 = vmatpush.bf16.msra.mxu2 %v1769_v33 }
 0x14e   : > { %s1666_s22 = sshll.u32 %s2492_s21, 3  ;;  %864 = vmatpush.bf16.msra.mxu3 %v1773_v36 }
 0x14f   : > { %s2242_s25 = scalar_lea.vmem [#allocation2], %s1666_s22 }
 0x150   : > { %v2245_v34 = vld [vmem:[%s2242_s25] sm:$0xff]  ;;  %p1757_p0 = scmp.ge.s32.totalorder %s2496_s30, 1 }
 0x151   : > { %v733_v37 = vpack.c.bf16 %v2245_v34, %v2245_v34  ;;  %838 = vmatpush.bf16.msrb.mxu2 %v1772_v35 }
 0x153   : > { %1675 = vmatmul.msk.bf16.vlgmr.msra.gmra.mxu0 %vm778_vm5, %v733_v37  ;;  %1684 = vmatmul.msk.bf16.vlgmr.msra.gmra.mxu2 %vm778_vm5, %v733_v37 }
 0x154   : > { %1702 = vmatmul.msk.bf16.vlgmr.msra.gmra.mxu3 %vm778_vm5, %v733_v37 }
 0x155   : > { %839 = vmatpush.bf16.msrb.mxu2 %v1771_v38 }
 0x163   : > { %1693 = vmatmul.msk.bf16.vlgmr.msrb.gmra.mxu2 %vm778_vm5, %v733_v37 }
 0x1d0   : > { %v791_v40 = vpop.f32.mrf.mxu0 }
 0x1d1   : > { %v792_v41 = vadd.f32 %v1866_v39, %v791_v40 }
 0x1d3   : > { %v870_v42 = vpack.c.bf16 %v792_v41, %v792_v41 }
 0x1d5   : > { %v875_v44 = vunpack.c.l.b16 %v870_v42 }
 0x1d6   : > { %v816_v45 = vpop.f32.mrf.mxu2 }
 0x1d7   : > { %v817_v46 = vadd.f32 %v1867_v43, %v816_v45  ;;  %v2258_v47 = vpack.c.b16 %v875_v44, %v875_v44  ;;  %v866_v48 = vpop.f32.mrf.mxu3 }
 0x1d8   : > { %v793_v49 = vpop.f32.mrf.mxu0  ;;  %v867_v59 = vadd.f32 %v1869_v56, %v866_v48 }
 0x1d9   : > { %v871_v50 = vpack.c.bf16 %v817_v46, %v817_v46  ;;  %877 = vrot.lane.b32.xlu1 %v2258_v47, %s1998_s26 }
 0x1da   : > { %v873_v61 = vpack.c.bf16 %v867_v59, %v867_v59 }
 0x1db   : > { %v900_v51 = vunpack.c.l.b16 %v871_v50 }
 0x1dc   : > { %v948_v1 = vunpack.c.l.b16 %v873_v61 }
 0x1dd   : > { %v901_v53 = vpack.c.b16 %v900_v51, %v900_v51 }
 0x1de   : > { %v818_v52 = vpop.f32.mrf.mxu2  ;;  %v949_v2 = vpack.c.b16 %v948_v1, %v948_v1  ;;  %v1109_v1 = vld [vmem:[%s2179_s0 + $0x4] sm:$0xf] }
 0x1df   : > { %v868_v54 = vpop.f32.mrf.mxu3 }
 0x1e1   : > { %902 = vrot.lane.b32.xlu1 %v901_v53, %s1998_s26 }
 0x1e6   : > { %v841_v57 = vpop.f32.mrf.mxu2 }
 0x1e7   : > { %v842_v58 = vadd.f32 %v1868_v55, %v841_v57 }
 0x1e9   : > { %v872_v60 = vpack.c.bf16 %v842_v58, %v842_v58 }
 0x1eb   : > { %v924_v62 = vunpack.c.l.b16 %v872_v60 }
 0x1ed   : > { %v2263_v63 = vpack.c.b16 %v924_v62, %v924_v62 }
 0x1ee   : > { %v843_v0 = vpop.f32.mrf.mxu2 }
 0x1ef   : > { %926 = vrot.lane.b32.xlu0 %v2263_v63, %s1998_s26 }
 0x1f7   : > { %950 = vrot.lane.b32.xlu0 %v949_v2, %s1998_s26 }
 0x24b   : > { %v878_v3 = vpop.permute.xlu1 %877 }
 0x24c   : > { %v884_v4 = vsel %vm879_vm6, %v878_v3, 0 }
 0x24d   : > { %893 = vmatpush.bf16.xpose.msrb.mxu0 %v884_v4 }
 0x253   : > { %v903_v5 = vpop.permute.xlu1 %902 }
 0x254   : > { %1703 = vmatmul.msk.bf16.vlgmr.msrb.gmra.mxu0 %vm879_vm6, %v870_v42  ;;  %v908_v6 = vsel %vm879_vm6, %v903_v5, 0 }
 0x255   : > { %917 = vmatpush.bf16.xpose.msra.mxu1 %v908_v6 }
 0x25c   : > { %1704 = vmatmul.msk.bf16.vlgmr.msra.gmra.mxu1 %vm879_vm6, %v871_v50 }
 0x261   : > { %v927_v7 = vpop.permute.xlu0 %926 }
 0x262   : > { %v932_v8 = vsel %vm879_vm6, %v927_v7, 0  ;;  %v1111_v7 = vld [vmem:[%s2179_s0 + $0xc] sm:$0xf] }
 0x263   : > { %941 = vmatpush.bf16.xpose.msra.mxu2 %v932_v8 }
 0x269   : > { %v951_v9 = vpop.permute.xlu0 %950 }
 0x26a   : > { %1705 = vmatmul.msk.bf16.vlgmr.msra.gmra.mxu2 %vm879_vm6, %v872_v60  ;;  %v956_v10 = vsel %vm879_vm6, %v951_v9, 0  ;;  %v1173_v9 = vsel %vm1024_vm7, %v1111_v7, 0 }
 0x26b   : > { %965 = vmatpush.bf16.xpose.msrb.mxu3 %v956_v10 }
 0x272   : > { %1706 = vmatmul.msk.bf16.vlgmr.msrb.gmra.mxu3 %vm879_vm6, %v873_v61 }
 0x2d1   : > { %v895_v11 = vpop.f32.mrf.mxu0 }
 0x2d2   : > { %v971_v12 = vsel %vm879_vm6, %v895_v11, -inf }
 0x2d3   : > { %972 = vmax.xlane.f32.xlu0 %v971_v12 }
 0x2d9   : > { %v897_v13 = vpop.f32.mrf.mxu0  ;;  %v919_v14 = vpop.f32.mrf.mxu1 }
 0x2da   : > { %v974_v15 = vsel %vm879_vm6, %v919_v14, -inf  ;;  %v1108_v13 = vld [vmem:[%s2179_s0] sm:$0xf] }
 0x2db   : > { %975 = vmax.xlane.f32.xlu1 %v974_v15 }
 0x2e1   : > { %v921_v16 = vpop.f32.mrf.mxu1 }
 0x2ed   : > { %v943_v17 = vpop.f32.mrf.mxu2 }
 0x2ee   : > { %v977_v22 = vsel %vm879_vm6, %v943_v17, -inf }
 0x2f4   : > { %1083 = vrot.lane.b32.xlu1 %v949_v2, %s1999_s20  ;;  %v1135_v2 = vsel %vm1024_vm7, %v1109_v1, 0 }
 0x2f5   : > { %v945_v18 = vpop.f32.mrf.mxu2  ;;  %v967_v19 = vpop.f32.mrf.mxu3 }
 0x2f6   : > { %v980_v20 = vsel %vm879_vm6, %v967_v19, -inf }
 0x2f7   : > { %981 = vmax.xlane.f32.xlu2 %v980_v20 }
 0x2fc   : > { %1041 = vrot.lane.b32.xlu1 %v901_v53, %s1999_s20 }
 0x2fd   : > { %v969_v21 = vpop.f32.mrf.mxu3 }
 0x2ff   : > { %978 = vmax.xlane.f32.xlu2 %v977_v22 }
 0x346   : > { %v973_v43 = vpop.xlane.xlu0 %972 }
 0x347   : > { %v983_v44 = vsub.f32 %v895_v11, %v973_v43  ;;  %v1110_v11 = vld [vmem:[%s2179_s0 + $0x8] sm:$0xf] }
 0x348   : > { %v1154_v12 = vsel %vm1024_vm7, %v1110_v11, 0  ;;  %v1873_v11 = vld [vmem:[%s665_s17] ss:$0 sm:$0xff] }
 0x349   : > { %v987_v45 = vmul.f32 1.442695, %v983_v44  ;;  %v2000_v44 = vmov 32.0  }
 0x34e   : > { %v976_v23 = vpop.xlane.xlu1 %975 }
 0x34f   : > { %v984_v24 = vsub.f32 %v919_v14, %v976_v23  ;;  %v1116_v14 = vsel %vm1024_vm7, %v1108_v13, 0  ;;  %v1782_v13 = vld [vmem:[%s2201_s5 + $0x28] sm:$0xff] }
 0x351   : > { %v989_v25 = vmul.f32 1.442695, %v984_v24 }
 0x353   : > { %1877 = vpow2.f32 %v989_v25 }
 0x359   : > { %v1878_v26 = vpop.eup %1877 }
 0x35a   : > { %v998_v27 = vsel %vm879_vm6, %v1878_v26, 0.0 }
 0x35b   : > { %999 = vadd.xlane.f32.xlu0 %v998_v27 }
 0x366   : > { %v1084_v28 = vpop.permute.xlu1 %1083 }
 0x367   : > { %v1089_v29 = vsel %vm1024_vm7, %v1084_v28, 0 }
 0x368   : > { %1098 = vmatpush.bf16.msra.mxu3 %v1089_v29 }
 0x36a   : > { %v982_v30 = vpop.xlane.xlu2 %981 }
 0x36b   : > { %v986_v31 = vsub.f32 %v967_v19, %v982_v30 }
 0x36c   : > { %1182 = vmatpush.bf16.msrb.mxu3 %v1173_v9  ;;  %v1784_v9 = vld [vmem:[%s2201_s5 + $0x38] sm:$0xff] }
 0x36d   : > { %v993_v32 = vmul.f32 1.442695, %v986_v31 }
 0x36e   : > { %v1042_v33 = vpop.permute.xlu1 %1041 }
 0x36f   : > { %1879 = vpow2.f32 %v993_v32  ;;  %1019 = vrot.lane.b32.xlu0 %v2258_v47, %s1999_s20  ;;  %v1047_v35 = vsel %vm1024_vm7, %v1042_v33, 0 }
 0x370   : > { %1056 = vmatpush.bf16.msrb.mxu1 %v1047_v35 }
 0x372   : > { %v979_v36 = vpop.xlane.xlu2 %978 }
 0x373   : > { %v985_v37 = vsub.f32 %v943_v17, %v979_v36 }
 0x374   : > { %1144 = vmatpush.bf16.msra.mxu1 %v1135_v2  ;;  %v1871_v2 = vld [vmem:[%s2494_s23] ss:$0 sm:$0xff] }
 0x375   : > { %v1880_v38 = vpop.eup %1879  ;;  %v991_v39 = vmul.f32 1.442695, %v985_v37  ;;  %v1870_v37 = vld [vmem:[%s2493_s3] ss:$0 sm:$0xff] }
 0x376   : > { %v1004_v40 = vsel %vm879_vm6, %v1880_v38, 0.0 }
 0x377   : > { %1881 = vpow2.f32 %v991_v39  ;;  %1005 = vadd.xlane.f32.xlu2 %v1004_v40 }
 0x378   : > { %1883 = vpow2.f32 %v987_v45 }
 0x37d   : > { %v1882_v41 = vpop.eup %1881 }
 0x37e   : > { %v1001_v42 = vsel %vm879_vm6, %v1882_v41, 0.0  ;;  %v1884_v46 = vpop.eup %1883 }
 0x37f   : > { %1002 = vadd.xlane.f32.xlu2 %v1001_v42  ;;  %v995_v47 = vsel %vm879_vm6, %v1884_v46, 0.0 }
 0x397   : > { %1062 = vrot.lane.b32.xlu2 %v2263_v63, %s1999_s20 }
 0x3c0   : > { %996 = vadd.xlane.f32.xlu2 %v995_v47 }
 0x3ce   : > { %v1000_v48 = vpop.xlane.xlu0 %999 }
 0x3cf   : > { %1885 = vrcp.f32 %v1000_v48 }
 0x3d5   : > { %v1886_v49 = vpop.eup %1885 }
 0x3d6   : > { %v1012_v50 = vmul.f32 %v1886_v49, %v1878_v26 }
 0x3d8   : > { %v1016_v51 = vpack.c.bf16 %v1012_v50, %v1012_v50 }
 0x3da   : > { %1708 = vmatmul.msk.bf16.vlgmr.msrb.gmra.mxu1 %vm879_vm6, %v1016_v51 }
 0x3db   : > { %1390 = vmatpush.bf16.msrb.mxu1 %v1784_v9 }
 0x3e1   : > { %v1020_v52 = vpop.permute.xlu0 %1019 }
 0x3e2   : > { %v1026_v53 = vsel %vm1024_vm7, %v1020_v52, 0 }
 0x3e3   : > { %1035 = vmatpush.bf16.msra.mxu0 %v1026_v53 }
 0x3e7   : > { %1125 = vmatpush.bf16.msrb.mxu0 %v1116_v14 }
 0x3ea   : > { %v1006_v54 = vpop.xlane.xlu2 %1005 }
 0x3eb   : > { %1887 = vrcp.f32 %v1006_v54 }
 0x3f1   : > { %v1888_v55 = vpop.eup %1887 }
 0x3f2   : > { %v1014_v56 = vmul.f32 %v1888_v55, %v1880_v38  ;;  %v1003_v57 = vpop.xlane.xlu2 %1002  ;;  %v1776_v55 = vld [vmem:[%s2192_s4 + $0x8] sm:$0xff] }
 0x3f3   : > { %1889 = vrcp.f32 %v1003_v57 }
 0x3f4   : > { %v1018_v58 = vpack.c.bf16 %v1014_v56, %v1014_v56  ;;  %v1775_v56 = vld [vmem:[%s2192_s4] sm:$0xff] }
 0x3f6   : > { %1710 = vmatmul.msk.bf16.vlgmr.msra.gmra.mxu3 %vm879_vm6, %v1018_v58 }
 0x3f9   : > { %v1890_v59 = vpop.eup %1889 }
 0x3fa   : > { %v1013_v60 = vmul.f32 %v1890_v59, %v1882_v41  ;;  %v1063_v61 = vpop.permute.xlu2 %1062 }
 0x3fb   : > { %v1068_v62 = vsel %vm1024_vm7, %v1063_v61, 0 }
 0x3fc   : > { %v1017_v63 = vpack.c.bf16 %v1013_v60, %v1013_v60  ;;  %1077 = vmatpush.bf16.msrb.mxu2 %v1068_v62 }
 0x3ff   : > { %1709 = vmatmul.msk.bf16.vlgmr.msrb.gmra.mxu2 %vm879_vm6, %v1017_v63 }
 0x400   : > { %1163 = vmatpush.bf16.msra.mxu2 %v1154_v12 }
 0x433   : > { %v997_v0 = vpop.xlane.xlu2 %996 }
 0x434   : > { %1891 = vrcp.f32 %v997_v0 }
 0x435   : > { %1893 = vrcp.f32 %v2000_v44 }
 0x43a   : > { %v1892_v3 = vpop.eup %1891 }
 0x43b   : > { %v1011_v4 = vmul.f32 %v1892_v3, %v1884_v46  ;;  %v1894_v45 = vpop.eup %1893 }
 0x43c   : > { %v1207_v46 = vmul.f32 32.0, %v1894_v45  ;;  %vm1211_vm8 = vweird.f32 %v1894_v45 }
 0x43d   : > { %v1015_v5 = vpack.c.bf16 %v1011_v4, %v1011_v4  ;;  %v1872_v4 = vld [vmem:[%s2495_s1] ss:$0 sm:$0xff] }
 0x43e   : > { %v1208_v47 = vsub.f32 1.0, %v1207_v46 }
 0x43f   : > { %1707 = vmatmul.msk.bf16.vlgmr.msra.gmra.mxu0 %vm879_vm6, %v1015_v5 }
 0x440   : > { %v1209_v48 = vmul.f32 %v1894_v45, %v1208_v47  ;;  %1270 = vmatpush.bf16.msra.mxu0 %v1776_v55 }
 0x442   : > { %v1210_v49 = vadd.f32 %v1894_v45, %v1209_v48 }
 0x444   : > { %v2319_v50 = vsel %vm1211_vm8, %v1894_v45, %v1210_v49  ;;  %1271 = vmatpush.bf16.msra.mxu0 %v1775_v56 }
 0x457   : > { %v1058_v6 = vpop.f32.mrf.mxu1 }
 0x458   : > { %v1105_v8 = vpack.c.bf16 %v1058_v6, %v1058_v6 }
 0x45a   : > { %1712 = vmatmul.msk.bf16.vlgmr.msra.gmra.mxu1 %vm879_vm6, %v1105_v8 }
 0x45f   : > { %v1060_v10 = vpop.f32.mrf.mxu1 }
 0x460   : > { %v1783_v10 = vld [vmem:[%s2201_s5 + $0x30] sm:$0xff] }
 0x461   : > { %1391 = vmatpush.bf16.msrb.mxu1 %v1783_v10 }
 0x465   : > { %1392 = vmatpush.bf16.msrb.mxu1 %v1782_v13 }
 0x479   : > { %v1100_v15 = vpop.f32.mrf.mxu3 }
 0x47a   : > { %v1107_v16 = vpack.c.bf16 %v1100_v15, %v1100_v15 }
 0x47c   : > { %1714 = vmatmul.msk.bf16.vlgmr.msrb.gmra.mxu3 %vm879_vm6, %v1107_v16  ;;  %v1781_v16 = vld [vmem:[%s2201_s5 + $0x20] sm:$0xff] }
 0x47d   : > { %1393 = vmatpush.bf16.msrb.mxu1 %v1781_v16 }
 0x481   : > { %v1102_v17 = vpop.f32.mrf.mxu3 }
 0x482   : > { %v1079_v18 = vpop.f32.mrf.mxu2 }
 0x483   : > { %v1106_v19 = vpack.c.bf16 %v1079_v18, %v1079_v18 }
 0x485   : > { %1713 = vmatmul.msk.bf16.vlgmr.msra.gmra.mxu2 %vm879_vm6, %v1106_v19 }
 0x48a   : > { %v1081_v20 = vpop.f32.mrf.mxu2 }
 0x48b   : > { %v1780_v20 = vld [vmem:[%s2201_s5 + $0x18] sm:$0xff] }
 0x48c   : > { %1394 = vmatpush.bf16.msrb.mxu1 %v1780_v20 }
 0x4bc   : > { %v1037_v21 = vpop.f32.mrf.mxu0 }
 0x4bd   : > { %v1104_v22 = vpack.c.bf16 %v1037_v21, %v1037_v21 }
 0x4bf   : > { %1711 = vmatmul.msk.bf16.vlgmr.msrb.gmra.mxu0 %vm879_vm6, %v1104_v22 }
 0x4c4   : > { %v1039_v23 = vpop.f32.mrf.mxu0 }
 0x4d7   : > { %v1146_v24 = vpop.f32.mrf.mxu1 }
 0x4d8   : > { %v1189_v31 = vsel %vm778_vm5, %v1146_v24, 0.0 }
 0x4df   : > { %v1148_v25 = vpop.f32.mrf.mxu1 }
 0x4e0   : > { %v1779_v25 = vld [vmem:[%s2201_s5 + $0x10] sm:$0xff] }
 0x4e1   : > { %1395 = vmatpush.bf16.msrb.mxu1 %v1779_v25 }
 0x4ff   : > { %v1184_v26 = vpop.f32.mrf.mxu3 }
 0x500   : > { %v1193_v38 = vsel %vm778_vm5, %v1184_v26, 0.0 }
 0x507   : > { %v1186_v27 = vpop.f32.mrf.mxu3 }
 0x508   : > { %v1165_v28 = vpop.f32.mrf.mxu2 }
 0x509   : > { %v1191_v35 = vsel %vm778_vm5, %v1165_v28, 0.0 }
 0x510   : > { %v1167_v29 = vpop.f32.mrf.mxu2 }
 0x53c   : > { %v1127_v30 = vpop.f32.mrf.mxu0 }
 0x53d   : > { %v1188_v32 = vsel %vm778_vm5, %v1127_v30, 0.0  ;;  %v1778_v30 = vld [vmem:[%s2201_s5 + $0x8] sm:$0xff] }
 0x53e   : > { %v1190_v33 = vadd.f32 %v1189_v31, %v1188_v32  ;;  %1396 = vmatpush.bf16.msrb.mxu1 %v1778_v30 }
 0x540   : > { %v1192_v36 = vadd.f32 %v1191_v35, %v1190_v33  ;;  %v1777_v35 = vld [vmem:[%s2201_s5] sm:$0xff] }
 0x542   : > { %v1194_v39 = vadd.f32 %v1193_v38, %v1192_v36  ;;  %1397 = vmatpush.bf16.msrb.mxu1 %v1777_v35 }
 0x544   : > { %v1129_v40 = vpop.f32.mrf.mxu0  ;;  %v1199_v41 = vadd.f32 %v1870_v37, %v1194_v39 }
 0x546   : > { %v1200_v42 = vadd.f32 %v1199_v41, %v2245_v34 }
 0x548   : > { %v1203_v43 = vsel %vm778_vm5, %v1200_v42, 0.0 }
 0x549   : > { %1204 = vadd.xlane.f32.xlu0 %v1203_v43 }
 0x5bc   : > { %v1205_v51 = vpop.xlane.xlu0 %1204 }
 0x5bd   : > { %v1213_v52 = vmul.f32 %v2319_v50, %v1205_v51 }
 0x5bf   : > { %v1214_v53 = vsub.f32 %v1200_v42, %v1213_v52 }
 0x5c1   : > { %v1215_v34 = vmul.f32 %v1214_v53, %v1214_v53 }
 0x5c3   : > { %v1216_v54 = vsel %vm778_vm5, %v1215_v34, 0.0 }
 0x5c4   : > { %1217 = vadd.xlane.f32.xlu1 %v1216_v54 }
 0x637   : > { %v1218_v57 = vpop.xlane.xlu1 %1217 }
 0x638   : > { %v1219_v58 = vmul.f32 %v1218_v57, %v2319_v50 }
 0x63a   : > { %v1220_v59 = vadd.f32 1e-12, %v1219_v58 }
 0x63c   : > { %1895 = vrsqrt.f32 %v1220_v59  ;;  %vm1227_vm10 = vweird.f32 %v1220_v59 }
 0x642   : > { %v1896_v60 = vpop.eup %1895 }
 0x643   : > { %v1222_v61 = vmul.f32 %v1896_v60, %v1220_v59  ;;  %vm1228_vm9 = vweird.f32 %v1896_v60 }
 0x644   : > { %vm1229_vm11 = vmor %vm1227_vm10, %vm1228_vm9 }
 0x645   : > { %v1223_v62 = vmul.f32 %v1896_v60, %v1222_v61 }
 0x647   : > { %v1224_v63 = vmul.f32 0.5, %v1223_v62  ;;  %v1874_v62 = vld [vmem:[%s673_s24] ss:$0 sm:$0xff] }
 0x649   : > { %v1225_v0 = vsub.f32 1.5, %v1224_v63 }
 0x64b   : > { %v1226_v1 = vmul.f32 %v1896_v60, %v1225_v0 }
 0x64d   : > { %v1230_v3 = vsel %vm1229_vm11, %v1896_v60, %v1226_v1 }
 0x64e   : > { %v1231_v5 = vmul.f32 %v1230_v3, %v1214_v53 }
 0x650   : > { %v1235_v6 = vmul.f32 %v1871_v2, %v1231_v5 }
 0x652   : > { %v2336_v7 = vadd.f32 %v1872_v4, %v1235_v6 }
 0x654   : > { %v1240_v8 = vpack.c.bf16 %v2336_v7, %v2336_v7 }
 0x656   : > { %1723 = vmatmul.msk.bf16.vlgmr.msra.gmra.mxu0 %vm778_vm5, %v1240_v8 }
 0x6d3   : > { %v1273_v12 = vpop.f32.mrf.mxu0 }
 0x6d4   : > { %v1274_v14 = vadd.f32 %v1873_v11, %v1273_v12 }
 0x6d6   : > { %v1278_v15 = vmul.f32 0.70710677, %v1274_v14  ;;  %v1277_v58 = vmul.f32 0.5, %v1274_v14 }
 0x6d8   : > { %v1279_v17 = vmul.f32 %v1278_v15, %v1278_v15 }
 0x6da   : > { %v1280_v18 = vmin.f32 %v1279_v17, 16.0 }
 0x6db   : > { %v1275_v19 = vpop.f32.mrf.mxu0 }
 0x6dc   : > { %v1281_v21 = vmul.f32 2.1237322e-06, %v1280_v18  ;;  %v1292_v22 = vmul.f32 3.8918573e-05, %v1280_v18 }
 0x6de   : > { %v1282_v23 = vadd.f32 0.00028619796, %v1281_v21  ;;  %v1293_v24 = vadd.f32 0.001143296, %v1292_v22 }
 0x6e0   : > { %v1283_v26 = vmul.f32 %v1282_v23, %v1280_v18  ;;  %v1294_v27 = vmul.f32 %v1293_v24, %v1280_v18 }
 0x6e2   : > { %v1295_v28 = vadd.f32 0.014752088, %v1294_v27  ;;  %v1284_v29 = vadd.f32 0.0036580483, %v1283_v26 }
 0x6e4   : > { %v1296_v31 = vmul.f32 %v1295_v28, %v1280_v18  ;;  %v1285_v33 = vmul.f32 %v1284_v29, %v1280_v18 }
 0x6e6   : > { %v1297_v32 = vadd.f32 0.112945676, %v1296_v31  ;;  %v1286_v38 = vadd.f32 0.05243302, %v1285_v33 }
 0x6e8   : > { %v1298_v36 = vmul.f32 %v1297_v32, %v1280_v18  ;;  %v1287_v41 = vmul.f32 %v1286_v38, %v1280_v18 }
 0x6ea   : > { %v1299_v37 = vadd.f32 0.4994258, %v1298_v36  ;;  %v1288_v42 = vadd.f32 0.18741608, %v1287_v41 }
 0x6ec   : > { %v1300_v39 = vmul.f32 %v1299_v37, %v1280_v18  ;;  %v1289_v44 = vmul.f32 %v1288_v42, %v1280_v18  ;;  %v1875_v18 = vld [vmem:[%s676_s15] ss:$0 sm:$0xff] }
 0x6ee   : > { %v1301_v40 = vadd.f32 1.0, %v1300_v39  ;;  %v1290_v48 = vadd.f32 1.1283791, %v1289_v44 }
 0x6f0   : > { %1897 = vrcp.f32 %v1301_v40  ;;  %v1313_v47 = vand.u32 2147483648, %v1301_v40  ;;  %v1311_v51 = vand.u32 2147483647, %v1301_v40  ;;  %vm1307_vm13 = vweird.f32 %v1301_v40 }
 0x6f1   : > { %v1291_v34 = vmul.f32 %v1290_v48, %v1278_v15 }
 0x6f2   : > { %v1314_v53 = vor.u32 1.1754944e-38, %v1313_v47  ;;  %vm1312_vm15 = vcmp.eq.f32.partialorder %v1311_v51, 8.507059e+37 }
 0x6f6   : > { %v1898_v43 = vpop.eup %1897 }
 0x6f7   : > { %v1303_v45 = vmul.f32 %v1898_v43, %v1301_v40  ;;  %vm1308_vm12 = vweird.f32 %v1898_v43 }
 0x6f8   : > { %vm1309_vm14 = vmor %vm1307_vm13, %vm1308_vm12 }
 0x6f9   : > { %v1304_v46 = vsub.f32 1.0, %v1303_v45 }
 0x6fb   : > { %v1305_v49 = vmul.f32 %v1898_v43, %v1304_v46 }
 0x6fd   : > { %v1306_v52 = vadd.f32 %v1898_v43, %v1305_v49 }
 0x6ff   : > { %v1310_v54 = vsel %vm1309_vm14, %v1898_v43, %v1306_v52 }
 0x700   : > { %v1315_v55 = vsel %vm1312_vm15, %v1314_v53, %v1310_v54 }
 0x701   : > { %v1316_v56 = vmul.f32 %v1315_v55, %v1291_v34 }
 0x703   : > { %v1724_v57 = vclamps-f32 %v1316_v56, 1.0 }
 0x705   : > { %v1319_v59 = vadd.f32 1.0, %v1724_v57 }
 0x707   : > { %v1320_v60 = vmul.f32 %v1319_v59, %v1277_v58 }
 0x709   : > { %v1321_v61 = vpack.c.bf16 %v1320_v60, %v1320_v60 }
 0x70b   : > { %1398 = vmatmul.bf16.vlgmr.msrb.gmra.mxu1 %v1321_v61 }
 0x788   : > { %v1399_v63 = vpop.f32.mrf.mxu1 }
 0x789   : > { %v1400_v0 = vadd.f32 %v1874_v62, %v1399_v63 }
 0x78b   : > { %v1403_v1 = vadd.f32 %v1400_v0, %v2336_v7 }
 0x78d   : > { %v1406_v2 = vsel %vm778_vm5, %v1403_v1, 0.0 }
 0x78e   : > { %1407 = vadd.xlane.f32.xlu2 %v1406_v2 }
 0x790   : > { %v1401_v3 = vpop.f32.mrf.mxu1 }
 0x801   : > { %v1408_v4 = vpop.xlane.xlu2 %1407 }
 0x802   : > { %v1409_v5 = vmul.f32 %v1408_v4, %v2319_v50 }
 0x804   : > { %v1410_v6 = vsub.f32 %v1403_v1, %v1409_v5 }
 0x806   : > { %v1411_v8 = vmul.f32 %v1410_v6, %v1410_v6 }
 0x808   : > { %v1412_v9 = vsel %vm778_vm5, %v1411_v8, 0.0 }
 0x809   : > { %1413 = vadd.xlane.f32.xlu2 %v1412_v9 }
 0x87c   : > { %v1414_v10 = vpop.xlane.xlu2 %1413 }
 0x87d   : > { %v1415_v11 = vmul.f32 %v1414_v10, %v2319_v50  ;;  %v1876_v50 = vld [vmem:[%s679_s29] ss:$0 sm:$0xff] }
 0x87f   : > { %v1416_v12 = vadd.f32 1e-12, %v1415_v11 }
 0x881   : > { %1899 = vrsqrt.f32 %v1416_v12  ;;  %vm1423_vm1 = vweird.f32 %v1416_v12 }
 0x887   : > { %v1900_v7 = vpop.eup %1899 }
 0x888   : > { %v1418_v13 = vmul.f32 %v1900_v7, %v1416_v12  ;;  %vm1424_vm0 = vweird.f32 %v1900_v7 }
 0x889   : > { %vm1425_vm2 = vmor %vm1423_vm1, %vm1424_vm0 }
 0x88a   : > { %v1419_v14 = vmul.f32 %v1900_v7, %v1418_v13 }
 0x88c   : > { %v1420_v15 = vmul.f32 0.5, %v1419_v14 }
 0x88e   : > { %v1421_v16 = vsub.f32 1.5, %v1420_v15 }
 0x890   : > { %v1422_v17 = vmul.f32 %v1900_v7, %v1421_v16 }
 0x892   : > { %v1426_v19 = vsel %vm1425_vm2, %v1900_v7, %v1422_v17 }
 0x893   : > { %v1427_v20 = vmul.f32 %v1426_v19, %v1410_v6  ;;  %1439 = sbr.rel (%p1757_p0) target bundleno = 2202 (0x89a), region = 88 }
 0x895   : > { %v1431_v21 = vmul.f32 %v1875_v18, %v1427_v20 }
 0x897   : > { %v1435_v22 = vadd.f32 %v1876_v50, %v1431_v21 }
 0x899   : > { %1440 = vst.msk [vmem:[%s2242_s25] sm:$0xff] %vm778_vm5, %v1435_v22 }
 0x89a PF: > { %s2497_s3 = sld [smem:[#allocation10_spill]] }
 0x8a0   : > { %p1758_p1 = scmp.ne.s32.totalorder %s2497_s3, 1 }
 0x8a2   : > { %1444 = sbr.rel (%p1758_p1) target bundleno = 2216 (0x8a8), region = 92 }
 0x8a7   : > { %1445 = vst.msk [vmem:[%s634_s9] sm:$0xff] %vm778_vm5, %v1435_v22 }
 0x8a8 PF: > { %s2499_s28 = sld [smem:[#allocation26_spill]]  ;;  %s1459_s25 = sshll.u32 %s634_s9, 4  ;;  %s1460_s25 = int_to_ptr.vmem [resolvable:$true] %s1459_s25 }
 0x8a9   : > { %s2500_s4 = sld [smem:[#allocation7_spill]] }
 0x8ae   : > { %s1457_s2 = scalar_lea.hbm %s2499_s28, %s1666_s22  ;;  %s1921_s26 = scalar_lea.hbm %s2499_s28, 16 }
 0x8af   : > { %s1461_s18 = sshll.u32 %s1457_s2, 4  ;;  %s2502_s1 = sand.u32 1, %s2500_s4   ;;  %s1462_s18 = int_to_ptr.hbm [resolvable:$true] %s1461_s18 }
 0x8b0   : > { %s1447_s19 = scalar_lea.sflag [#allocation4], %s2502_s1  ;;  %s1915_s21 = sshra.s32 %s1462_s18, 4  ;;  %s1916_s21 = int_to_ptr.hbm [resolvable:$true] %s1915_s21 }
 0x8b1   : > { %s1917_s5 = scalar_lea.hbm %s1916_s21, 8  ;;  %p1922_p6 = scmp.lt.s32.totalorder %s1916_s21, %s2499_s28 }
 0x8b2   : > { %p1918_p2 = scmp.ne.s32.totalorder %s1916_s21, %s1917_s5  ;;  %p1923_p7 = scmp.lt.s32.totalorder %s1921_s26, %s1917_s5 }
 0x8b4   : > { %p1919_p4 = pnand %p1918_p2, %p2133_p3  ;;  %p1924_p9 = por %p1923_p7, %p1922_p6 }
 0x8b6   : > { %p1920_p5 = pneg %p1919_p4 }
 0x8b8   : > { %p1925_p10 = pnand %p1924_p9, %p1920_p5 }
 0x8ba   : > { %1928 = shalt.err (!%p1925_p10)
}
 0x8bb   : > { %1785 = dma.vmem_to_hbm [thread:$0]  (%p2133_p3), %s1460_s25, 128, %s1462_s18, %s1447_s19  }
 0x8bc PF: > { %s2503_s9 = sld [smem:[#allocation13_spill]] }
 0x8bd   : > { %s2504_s27 = sld [smem:[#allocation6_spill]] }
 0x8c2   : > { %p1791_p11 = scmp.ge.s32.totalorder %s2503_s9, 2 }
 0x8c3   : > { %s1473_s30 = sand.u32 1, %s2504_s27  }
 0x8c4   : > { %p1788_p12 = pnand %p1791_p11, %p2144_p8  ;;  %s1474_s3 = scalar_lea.sflag [#allocation4], %s1473_s30 }
 0x8c6   : > { %p1789_p13 = pneg %p1788_p12 }
 0x8c8   : > { %1962 = dma.done.wait (%p1789_p13), %s1474_s3, 128  }
 0x8c9   : > { %1964 = vsyncadd (%p1789_p13), %s1474_s3, 4294967168  ;;  %s28_s25 = sadd.s32 1, %s2503_s9   ;;  %s2506_s18 = sld [smem:[#allocation7_spill]] }
 0x8ca   : > { %p25_p0 = scmp.ge.s32.totalorder %s28_s25, 6   ;;  %s2507_s19 = sld [smem:[#allocation8_spill]] }
 0x8cb   : > { %s2508_s20 = sld [smem:[#allocation17_spill]] }
 0x8cc   : > { %s2509_s21 = sld [smem:[#allocation11_spill]]  ;;  %27 = sbr.rel (!%p25_p0) target bundleno = 14 (0xe), region = 163 }
 0x8cd   : > { %s2510_s22 = sld [smem:[#allocation12_spill]] }
 0x8ce   : > { %s2511_s23 = sld [smem:[#allocation14_spill]] }
 0x8cf   : > { %s2512_s24 = sld [smem:[#allocation16_spill]] }
 0x8d1   :  { %1480 = vsyncpa [#allocation4], 1 }
 0x8d2   :  { %1482 = vsyncpa [#allocation4 + $0x1], 1 }

</bundles_post_ra>
